<compile_context>
chip_gen: v7x
topology: tpu7x:2x2x1
jax: 0.10.0
libtpu: 0.0.40
codegen_flags: <defaults>
</compile_context>

<pallas_src>
import jax
import jax.numpy as jnp
from jax.experimental import pallas as pl
from jax.experimental.pallas import tpu as pltpu

IN_FEATURES = 10
HIDDEN = 10          # net1 hidden size (dead in forward, kept only in init)
OUT_FEATURES = 5


def toy_mp_kernel(xt_ref, w2_ref, b2_ref, ot_ref):
    # xt_ref: (IN_FEATURES, TB)            -- batch on the lane axis
    # w2_ref: (OUT_FEATURES, IN_FEATURES)  -- PyTorch (out, in) layout
    # b2_ref: (OUT_FEATURES, 1)
    # ot_ref: (OUT_FEATURES, TB)           -- lane-dense output
    y = jnp.dot(w2_ref[...], xt_ref[...], preferred_element_type=jnp.float32)
    ot_ref[...] = (y + b2_ref[...]).astype(ot_ref.dtype)


def _pick_batch_tile(B):
    # Largest lane-aligned tile that divides B; fall back to one block.
    for cand in (512, 256, 128):
        if B % cand == 0:
            return cand
    return B


def toy_mp_forward(x, w2, b2, w1=None, b1=None):
    """x: (B, 10) f32.  w2: (5, 10) (out, in).  b2: (5,).

    w1/b1 (net1) are accepted for API parity with the PyTorch module but are
    dead in the forward pass and never shipped to the kernel."""
    del w1, b1  # dead in ToyMpModel.forward
    B = x.shape[0]
    tb = _pick_batch_tile(B)
    grid = (pl.cdiv(B, tb),)

    xt = x.T                                   # (10, B): batch on lane axis
    b2c = b2.reshape(OUT_FEATURES, 1)

    yt = pl.pallas_call(
        toy_mp_kernel,
        out_shape=jax.ShapeDtypeStruct((OUT_FEATURES, B), jnp.float32),
        grid=grid,
        in_specs=[
            pl.BlockSpec((IN_FEATURES, tb), lambda i: (0, i)),
            pl.BlockSpec((OUT_FEATURES, IN_FEATURES), lambda i: (0, 0)),
            pl.BlockSpec((OUT_FEATURES, 1), lambda i: (0, 0)),
        ],
        out_specs=pl.BlockSpec((OUT_FEATURES, tb), lambda i: (0, i)),
        compiler_params=pltpu.CompilerParams(
            dimension_semantics=("parallel",)),
    )(xt, w2, b2c)

    return yt.T                                # back to PyTorch's (B, 5)


def init_params(key):
    """Mimics torch.nn.Linear init: U(-1/sqrt(fan_in), 1/sqrt(fan_in)).
    Weights stored PyTorch-style as (out_features, in_features)."""
    k1, k2, k3, k4 = jax.random.split(key, 4)
    bound1 = 1.0 / jnp.sqrt(IN_FEATURES)
    bound2 = 1.0 / jnp.sqrt(HIDDEN)
    # net1 parameters exist in the module but are dead in forward().
    w1 = jax.random.uniform(k1, (HIDDEN, IN_FEATURES), jnp.float32, -bound1, bound1)
    b1 = jax.random.uniform(k2, (HIDDEN,), jnp.float32, -bound1, bound1)
    # net2 parameters: the live path.
    w2 = jax.random.uniform(k3, (OUT_FEATURES, HIDDEN), jnp.float32, -bound2, bound2)
    b2 = jax.random.uniform(k4, (OUT_FEATURES,), jnp.float32, -bound2, bound2)
    return w1, b1, w2, b2


if __name__ == "__main__":
    key = jax.random.PRNGKey(0)
    kx, kp = jax.random.split(key)

    B = 256  # multiple of 128 -> lane-aligned batch tiles, grid of 2 steps
    x = jax.random.normal(kx, (B, IN_FEATURES), jnp.float32)
    w1, b1, w2, b2 = init_params(kp)

    out = toy_mp_forward(x, w2, b2, w1, b1)
    out = jax.block_until_ready(out)

    # Reference: forward() returns net2(x); the net1/relu/div expression is discarded.
    ref = x @ w2.T + b2
    assert out.shape == (B, OUT_FEATURES)
    assert jnp.allclose(out, ref, atol=1e-5, rtol=1e-5)

    print("KERNEL_OK")
</pallas_src>

<mosaic_0001>
module attributes {stable_mosaic.version = 11 : i64} {
  func.func @toy_mp_kernel(%arg0: i32, %arg1: memref<10x256xf32, #tpu.memory_space<vmem>>, %arg2: memref<5x10xf32, #tpu.memory_space<vmem>>, %arg3: memref<5x1xf32, #tpu.memory_space<vmem>>, %arg4: memref<5x256xf32, #tpu.memory_space<vmem>>) attributes {dimension_semantics = [#tpu.dimension_semantics<parallel>], iteration_bounds = array<i64: 1>, scalar_prefetch = 0 : i64, scratch_operands = 0 : i64, tpu.core_type = #tpu.core_type<tc>, window_params = [{transform_indices = @transform_0, window_bounds = array<i64: 10, 256>}, {pipeline_mode = #tpu.pipeline_mode<synchronous>, transform_indices = @transform_1, window_bounds = array<i64: 5, 10>}, {pipeline_mode = #tpu.pipeline_mode<synchronous>, transform_indices = @transform_2, window_bounds = array<i64: 5, 1>}, {transform_indices = @transform_3, window_bounds = array<i64: 5, 256>}]} {
    %c0 = arith.constant 0 : index
    %c0_0 = arith.constant 0 : index
    %0 = vector.load %arg2[%c0, %c0_0] : memref<5x10xf32, #tpu.memory_space<vmem>>, vector<5x10xf32>
    %c0_1 = arith.constant 0 : index
    %c0_2 = arith.constant 0 : index
    %1 = vector.load %arg1[%c0_1, %c0_2] : memref<10x256xf32, #tpu.memory_space<vmem>>, vector<10x256xf32>
    %cst = arith.constant dense<0.000000e+00> : vector<5x256xf32>
    %2 = tpu.matmul %0, %1, %cst {dimension_numbers = #tpu.dot_dimension_numbers<[1], [0], [0], [1], [0, 0, 1, 1], [], []>} : vector<5x10xf32>, vector<10x256xf32>, vector<5x256xf32> -> vector<5x256xf32>
    %c0_3 = arith.constant 0 : index
    %c0_4 = arith.constant 0 : index
    %3 = vector.load %arg3[%c0_3, %c0_4] : memref<5x1xf32, #tpu.memory_space<vmem>>, vector<5x1xf32>
    %4 = vector.broadcast %3 : vector<5x1xf32> to vector<5x256xf32>
    %5 = arith.addf %2, %4 : vector<5x256xf32>
    %c0_5 = arith.constant 0 : index
    %c0_6 = arith.constant 0 : index
    %6 = vector.load %arg4[%c0_5, %c0_6] : memref<5x256xf32, #tpu.memory_space<vmem>>, vector<5x256xf32>
    tpu.vector_store %arg4[%c0_5, %c0_6], %5 {strides = array<i32>} : memref<5x256xf32, #tpu.memory_space<vmem>>, vector<5x256xf32>,
    return
  }
  func.func @transform_0(%arg0: i32) -> (i32, i32) {
    %c0_i32 = arith.constant 0 : i32
    %c0_i32_0 = arith.constant 0 : i32
    return %c0_i32, %arg0 : i32, i32
  }
  func.func @transform_1(%arg0: i32) -> (i32, i32) {
    %c0_i32 = arith.constant 0 : i32
    %c0_i32_0 = arith.constant 0 : i32
    %c0_i32_1 = arith.constant 0 : i32
    return %c0_i32, %c0_i32_0 : i32, i32
  }
  func.func @transform_2(%arg0: i32) -> (i32, i32) {
    %c0_i32 = arith.constant 0 : i32
    %c0_i32_0 = arith.constant 0 : i32
    %c0_i32_1 = arith.constant 0 : i32
    return %c0_i32, %c0_i32_0 : i32, i32
  }
  func.func @transform_3(%arg0: i32) -> (i32, i32) {
    %c0_i32 = arith.constant 0 : i32
    %c0_i32_0 = arith.constant 0 : i32
    return %c0_i32, %arg0 : i32, i32
  }
}

</mosaic_0001>

<bundles_post_ra>
// kernel: tpu_custom_call.1
= control target key start
LH: loop header
LB: loop body
LE: loop exit
PB: predicated region body
PF: predicated region fallthrough
CT: control target
= control target key end

     0   :  { %8 = vsyncpa [#allocation3], 0  ;;  %s261_s0 = inlined_call_operand.hbm [shape: f32[10,256], index: 0, kind: input, shape index: {}]   ;;  %s262_s1 = inlined_call_operand.vmem [shape: f32[5,10], index: 1, kind: input, shape index: {}]   ;;  %s263_s2 = inlined_call_operand.vmem [shape: f32[5,1], index: 2, kind: input, shape index: {}]   ;;  %s264_s3 = inlined_call_operand.hbm [shape: f32[5,256], index: 3, kind: output, shape index: {}]  }
   0x1   :  { %9 = vsyncpa [#allocation4], 0  ;;  %s204_s12 = smov [#allocation2]   ;;  %s156_s16 = scalar_lea.hbm %s261_s0, 512 }
   0x2   :  { %s15_s13 = sshll.u32 %s204_s12, 4  ;;  %p157_p0 = scmp.ne.s32.totalorder %s261_s0, %s156_s16  ;;  %s16_s13 = int_to_ptr.vmem [resolvable:$true] %s15_s13 }
   0x3   :  { %p160_p1 = scmp.lt.u32.totalorder %s156_s16, %s261_s0 }
   0x5   :  { %p162_p2 = pnand %p160_p1, %p157_p0 }
   0x7   :  { %165 = shalt.err (!%p162_p2)
}
   0x8   :  { %s166_s21 = scalar_lea.vmem %s16_s13, 512  ;;  %p171_p4 = scmp.lt.s32.totalorder %s16_s13, %s16_s13 }
   0x9   :  { %p167_p3 = scmp.ne.s32.totalorder %s16_s13, %s166_s21  ;;  %p172_p5 = scmp.lt.s32.totalorder %s166_s21, %s166_s21 }
   0xb   :  { %p173_p6 = por %p172_p5, %p171_p4 }
   0xd   :  { %p174_p7 = pnand %p173_p6, %p167_p3 }
   0xf   :  { %177 = shalt.err (!%p174_p7)
}
  0x10   :  { %s205_s22 = smov 256   ;;  %s206_s23 = smov 16  }
  0x11   :  { %21 = dma.hbm_to_vmem [thread:$0]  %s261_s0, 512, %s16_s13, [#allocation3], %s205_s22, %s205_s22, %s206_s23  }
  0x12   :  { %200 = dma.done.wait [#allocation3], 512  }
  0x13   :  { %201 = vsyncadd [#allocation3], 4294966784  ;;  %v207_v0 = vmov 0.0   ;;  %v208_v1 = vmov 0   ;;  %vm44_vm0 = vcmask 1041408   ;;  %vm209_vm1 = vmmov 1  }
  0x14   :  { %115 = vmatprep.mubr.f32.mxu0 %v207_v0  ;;  %155 = vset.pattern.permute.xlu0 %v208_v1  ;;  %vm143_vm2 = vmpackc.low %vm44_vm0, %vm209_vm1  ;;  %v31_v2 = vld [vmem:[#allocation2 + $0x8] sm:$0xff]  ;;  %v33_v3 = vld [vmem:[#allocation2 + $0x18] sm:$0x3]  ;;  %vm40_vm3 = vcmask 80896   ;;  %s210_s29 = smov [#allocation5]  }
  0x15   :  { %v30_v4 = vld [vmem:[#allocation2] sm:$0xff]  ;;  %v142_v5 = vpack.c.bf16 %v33_v3, %v31_v2  ;;  %v32_v6 = vld [vmem:[#allocation2 + $0x10] sm:$0x3]  ;;  %s130_s30 = sshll.u32 %s210_s29, 4  ;;  %s131_s30 = int_to_ptr.vmem [resolvable:$true] %s130_s30 }
  0x16   :  { %v34_v7 = vld [vmem:[%s263_s2] sm:$0x1f]  ;;  %v145_v8 = vpack.c.bf16 %v32_v6, %v30_v4  ;;  %s178_s2 = scalar_lea.vmem %s131_s30, 256  ;;  %p183_p9 = scmp.lt.s32.totalorder %s131_s30, %s131_s30 }
  0x17   :  { %37 = vperm.xlu0 %155, %v34_v7   ;;  %144 = vmatprep.subr.msk.bf16.mxu0 %vm143_vm2, %v142_v5  ;;  %v29_v9 = vld [vmem:[%s262_s1] sm:$0x1f]  ;;  %p179_p8 = scmp.ne.s32.totalorder %s131_s30, %s178_s2  ;;  %p184_p10 = scmp.lt.s32.totalorder %s178_s2, %s178_s2 }
  0x18   :  { %147 = vmatpush1.bf16.msk.msra.mxu0 %vm143_vm2, %v145_v8 }
  0x19   :  { %p185_p11 = por %p184_p10, %p183_p9 }
  0x1b   :  { %141 = vmatmul.mubr.msk.f32.vlgmr.msra.gmra.mrb[0].mxu0 %vm40_vm3, %v29_v9  ;;  %p186_p12 = pnand %p185_p11, %p179_p8 }
  0x96   :  { %v38_v10 = vpop.permute.xlu0 %37 }
  0xee   :  { %v117_v11 = vpop.f32.mrb[0].mxu0 }
  0xef   :  { %v118_v12 = vadd.f32 %v117_v11, %v38_v10  ;;  %v119_v13 = vpop.f32.mrb[1].mxu0 }
  0xf0   :  { %v120_v14 = vadd.f32 %v119_v13, %v38_v10 }
  0xf1   :  { %122 = vst [vmem:[#allocation5] sm:$0x1f] %v118_v12 }
  0xf2   :  { %123 = vst [vmem:[#allocation5 + $0x8] sm:$0x1f] %v120_v14 }
  0xf3   :  { %189 = shalt.err (!%p186_p12)
}
  0xf4   :  { %s190_s5 = scalar_lea.hbm %s264_s3, 256 }
  0xf5   :  { %p191_p13 = scmp.ne.s32.totalorder %s264_s3, %s190_s5  ;;  %p194_p0 = scmp.lt.u32.totalorder %s190_s5, %s264_s3 }
  0xf7   :  { %p196_p1 = pnand %p194_p0, %p191_p13 }
  0xf9   :  { %199 = shalt.err (!%p196_p1)
}
  0xfa   :  { %133 = dma.vmem_to_hbm [thread:$0]  %s131_s30, 256, %s264_s3, [#allocation4]  }
  0xfb   :  { %202 = dma.done.wait [#allocation4], 256  }
  0xfc   :  { %203 = vsyncadd [#allocation4], 4294967040 }
  0xfd   :  { %137 = vsyncpa [#allocation3], 1 }
  0xfe   :  { %138 = vsyncpa [#allocation4], 1 }

</bundles_post_ra>
